<compile_context>
chip_gen: v7x
topology: tpu7x:2x2x1
jax: 0.10.0
libtpu: 0.0.40
codegen_flags: <defaults>
</compile_context>

<pallas_src>
import functools

import jax
import jax.numpy as jnp
from jax.experimental import pallas as pl
from jax.experimental.pallas import tpu as pltpu


def _downsample_kernel(x_ref, a_ref, p_ref, o_ref, *, C, C_out, THo):
    # x_ref: (1, C, 2*THo, W)       input tile, NCHW layout (W on lanes)
    # a_ref: (C, C_out*THo, 2*THo)  fused (1x1 conv o vertical 2x-avg) matrices
    # p_ref: (W, Wo)                horizontal 2x-avg matrix
    # o_ref: (1, C_out, THo, Wo)    output tile, NCHW layout (Wo on lanes)
    acc = jnp.dot(a_ref[0], x_ref[0, 0], preferred_element_type=jnp.float32)
    for c in range(1, C):
        acc += jnp.dot(a_ref[c], x_ref[0, c], preferred_element_type=jnp.float32)
    out = jnp.dot(acc, p_ref[...], preferred_element_type=jnp.float32)  # (C_out*THo, Wo)
    for o in range(C_out):
        o_ref[0, o] = out[o * THo:(o + 1) * THo, :].astype(o_ref.dtype)


def _pick_tile_ho(Ho, C, W, bytes_cap=2 * 1024 * 1024):
    # Valid tile heights: divisors t of Ho with t % 8 == 0 (sublane rule for the
    # output block) or t == Ho (block == full dim). Pick the largest that keeps
    # the input block (C * 2t * W * 4 bytes) under the cap.
    cands = [t for t in range(1, Ho + 1) if Ho % t == 0 and (t % 8 == 0 or t == Ho)]
    fits = [t for t in cands if C * 2 * t * W * 4 <= bytes_cap]
    return max(fits) if fits else min(cands)


def downsample(x_nchw, w_oi):
    """x_nchw: (N, C_in, H, W) float32; w_oi: (C_out, C_in) 1x1-conv weight."""
    N, C, H, W = x_nchw.shape
    assert H % 2 == 0 and W % 2 == 0, "even H,W required for exact 2x2-avg equivalence"
    Ho, Wo = H // 2, W // 2
    C_out = w_oi.shape[0]
    assert w_oi.shape == (C_out, C)
    dtype = x_nchw.dtype

    THo = _pick_tile_ho(Ho, C, W)
    TH = 2 * THo

    # Tiny constant operator matrices (built once in the wrapper, resident in
    # VMEM across the whole grid since their block index never changes):
    #   V[i, h] = 0.5 * (h // 2 == i)            vertical 2x average inside a tile
    #   A[c, o*THo + i, h] = w[o, c] * V[i, h]   conv weight fused into the pool
    #   P[w, j] = 0.5 * (w // 2 == j)            horizontal 2x average
    V = 0.5 * (jnp.arange(TH)[None, :] // 2 == jnp.arange(THo)[:, None]).astype(dtype)
    A = (w_oi.T.astype(dtype)[:, :, None, None] * V[None, None]).reshape(C, C_out * THo, TH)
    P = 0.5 * (jnp.arange(W)[:, None] // 2 == jnp.arange(Wo)[None, :]).astype(dtype)

    kernel = functools.partial(_downsample_kernel, C=C, C_out=C_out, THo=THo)

    return pl.pallas_call(
        kernel,
        out_shape=jax.ShapeDtypeStruct((N, C_out, Ho, Wo), dtype),
        grid=(N, Ho // THo),
        in_specs=[
            pl.BlockSpec((1, C, TH, W), lambda n, i: (n, 0, i, 0)),
            pl.BlockSpec((C, C_out * THo, TH), lambda n, i: (0, 0, 0)),
            pl.BlockSpec((W, Wo), lambda n, i: (0, 0)),
        ],
        out_specs=pl.BlockSpec((1, C_out, THo, Wo), lambda n, i: (n, 0, i, 0)),
        compiler_params=pltpu.CompilerParams(
            dimension_semantics=("parallel", "parallel"),
        ),
    )(x_nchw, A, P)


def _reference(x_nchw, w_oi):
    """Pure-JAX reference: 2x2 avg pool + 1x1 conv (matches the PyTorch module)."""
    N, C, H, W = x_nchw.shape
    Ho, Wo = H // 2, W // 2
    pooled = x_nchw.reshape(N, C, Ho, 2, Wo, 2).mean(axis=(3, 5))   # (N, C, Ho, Wo)
    return jnp.einsum("oc,nchw->nohw", w_oi, pooled)


if __name__ == "__main__":
    # Module config: DownSample(in_channels=4, s_factor=4) -> C_out = 8
    in_channels, s_factor = 4, 4
    N, H, W = 2, 16, 16

    key = jax.random.PRNGKey(0)
    kx, kw = jax.random.split(key)
    x = jax.random.normal(kx, (N, in_channels, H, W), dtype=jnp.float32)
    # 1x1 conv weight, shape (C_out, C_in) (kernel spatial dims are 1x1, no bias).
    w = jax.random.normal(kw, (in_channels + s_factor, in_channels),
                          dtype=jnp.float32) * 0.1

    y = jax.block_until_ready(downsample(x, w))
    y_ref = _reference(x, w)

    assert y.shape == (N, in_channels + s_factor, H // 2, W // 2)
    assert jnp.allclose(y, y_ref, atol=1e-4, rtol=1e-4), \
        float(jnp.max(jnp.abs(y - y_ref)))

    print("KERNEL_OK")
</pallas_src>

<mosaic_0001>
module attributes {stable_mosaic.version = 11 : i64} {
  func.func @_downsample_kernel(%arg0: i32, %arg1: i32, %arg2: memref<1x4x16x16xf32, #tpu.memory_space<vmem>>, %arg3: memref<4x64x16xf32, #tpu.memory_space<vmem>>, %arg4: memref<16x8xf32, #tpu.memory_space<vmem>>, %arg5: memref<1x8x8x8xf32, #tpu.memory_space<vmem>>) attributes {dimension_semantics = [#tpu.dimension_semantics<parallel>, #tpu.dimension_semantics<parallel>], iteration_bounds = array<i64: 2, 1>, scalar_prefetch = 0 : i64, scratch_operands = 0 : i64, tpu.core_type = #tpu.core_type<tc>, window_params = [{transform_indices = @transform_0, window_bounds = array<i64: 1, 4, 16, 16>}, {pipeline_mode = #tpu.pipeline_mode<synchronous>, transform_indices = @transform_1, window_bounds = array<i64: 4, 64, 16>}, {pipeline_mode = #tpu.pipeline_mode<synchronous>, transform_indices = @transform_2, window_bounds = array<i64: 16, 8>}, {transform_indices = @transform_3, window_bounds = array<i64: 1, 8, 8, 8>}]} {
    %c0 = arith.constant 0 : index
    %c0_0 = arith.constant 0 : index
    %c0_1 = arith.constant 0 : index
    %0 = vector.load %arg3[%c0, %c0_0, %c0_1] : memref<4x64x16xf32, #tpu.memory_space<vmem>>, vector<1x64x16xf32>
    %1 = vector.shape_cast %0 : vector<1x64x16xf32> to vector<64x16xf32>
    %c0_2 = arith.constant 0 : index
    %c0_3 = arith.constant 0 : index
    %c0_4 = arith.constant 0 : index
    %c0_5 = arith.constant 0 : index
    %2 = vector.load %arg2[%c0_2, %c0_3, %c0_4, %c0_5] : memref<1x4x16x16xf32, #tpu.memory_space<vmem>>, vector<1x1x16x16xf32>
    %3 = vector.shape_cast %2 : vector<1x1x16x16xf32> to vector<16x16xf32>
    %cst = arith.constant dense<0.000000e+00> : vector<64x16xf32>
    %4 = tpu.matmul %1, %3, %cst {dimension_numbers = #tpu.dot_dimension_numbers<[1], [0], [0], [1], [0, 0, 1, 1], [], []>} : vector<64x16xf32>, vector<16x16xf32>, vector<64x16xf32> -> vector<64x16xf32>
    %c1 = arith.constant 1 : index
    %c0_6 = arith.constant 0 : index
    %c0_7 = arith.constant 0 : index
    %5 = vector.load %arg3[%c1, %c0_6, %c0_7] : memref<4x64x16xf32, #tpu.memory_space<vmem>>, vector<1x64x16xf32>
    %6 = vector.shape_cast %5 : vector<1x64x16xf32> to vector<64x16xf32>
    %c0_8 = arith.constant 0 : index
    %c1_9 = arith.constant 1 : index
    %c0_10 = arith.constant 0 : index
    %c0_11 = arith.constant 0 : index
    %7 = vector.load %arg2[%c0_8, %c1_9, %c0_10, %c0_11] : memref<1x4x16x16xf32, #tpu.memory_space<vmem>>, vector<1x1x16x16xf32>
    %8 = vector.shape_cast %7 : vector<1x1x16x16xf32> to vector<16x16xf32>
    %cst_12 = arith.constant dense<0.000000e+00> : vector<64x16xf32>
    %9 = tpu.matmul %6, %8, %cst_12 {dimension_numbers = #tpu.dot_dimension_numbers<[1], [0], [0], [1], [0, 0, 1, 1], [], []>} : vector<64x16xf32>, vector<16x16xf32>, vector<64x16xf32> -> vector<64x16xf32>
    %10 = arith.addf %4, %9 : vector<64x16xf32>
    %c2 = arith.constant 2 : index
    %c0_13 = arith.constant 0 : index
    %c0_14 = arith.constant 0 : index
    %11 = vector.load %arg3[%c2, %c0_13, %c0_14] : memref<4x64x16xf32, #tpu.memory_space<vmem>>, vector<1x64x16xf32>
    %12 = vector.shape_cast %11 : vector<1x64x16xf32> to vector<64x16xf32>
    %c0_15 = arith.constant 0 : index
    %c2_16 = arith.constant 2 : index
    %c0_17 = arith.constant 0 : index
    %c0_18 = arith.constant 0 : index
    %13 = vector.load %arg2[%c0_15, %c2_16, %c0_17, %c0_18] : memref<1x4x16x16xf32, #tpu.memory_space<vmem>>, vector<1x1x16x16xf32>
    %14 = vector.shape_cast %13 : vector<1x1x16x16xf32> to vector<16x16xf32>
    %cst_19 = arith.constant dense<0.000000e+00> : vector<64x16xf32>
    %15 = tpu.matmul %12, %14, %cst_19 {dimension_numbers = #tpu.dot_dimension_numbers<[1], [0], [0], [1], [0, 0, 1, 1], [], []>} : vector<64x16xf32>, vector<16x16xf32>, vector<64x16xf32> -> vector<64x16xf32>
    %16 = arith.addf %10, %15 : vector<64x16xf32>
    %c3 = arith.constant 3 : index
    %c0_20 = arith.constant 0 : index
    %c0_21 = arith.constant 0 : index
    %17 = vector.load %arg3[%c3, %c0_20, %c0_21] : memref<4x64x16xf32, #tpu.memory_space<vmem>>, vector<1x64x16xf32>
    %18 = vector.shape_cast %17 : vector<1x64x16xf32> to vector<64x16xf32>
    %c0_22 = arith.constant 0 : index
    %c3_23 = arith.constant 3 : index
    %c0_24 = arith.constant 0 : index
    %c0_25 = arith.constant 0 : index
    %19 = vector.load %arg2[%c0_22, %c3_23, %c0_24, %c0_25] : memref<1x4x16x16xf32, #tpu.memory_space<vmem>>, vector<1x1x16x16xf32>
    %20 = vector.shape_cast %19 : vector<1x1x16x16xf32> to vector<16x16xf32>
    %cst_26 = arith.constant dense<0.000000e+00> : vector<64x16xf32>
    %21 = tpu.matmul %18, %20, %cst_26 {dimension_numbers = #tpu.dot_dimension_numbers<[1], [0], [0], [1], [0, 0, 1, 1], [], []>} : vector<64x16xf32>, vector<16x16xf32>, vector<64x16xf32> -> vector<64x16xf32>
    %22 = arith.addf %16, %21 : vector<64x16xf32>
    %c0_27 = arith.constant 0 : index
    %c0_28 = arith.constant 0 : index
    %23 = vector.load %arg4[%c0_27, %c0_28] : memref<16x8xf32, #tpu.memory_space<vmem>>, vector<16x8xf32>
    %cst_29 = arith.constant dense<0.000000e+00> : vector<64x8xf32>
    %24 = tpu.matmul %22, %23, %cst_29 {dimension_numbers = #tpu.dot_dimension_numbers<[1], [0], [0], [1], [0, 0, 1, 1], [], []>} : vector<64x16xf32>, vector<16x8xf32>, vector<64x8xf32> -> vector<64x8xf32>
    %25 = vector.extract_strided_slice %24 {offsets = [0, 0], sizes = [8, 8], strides = [1, 1]} : vector<64x8xf32> to vector<8x8xf32>
    %c0_30 = arith.constant 0 : index
    %c0_31 = arith.constant 0 : index
    %c0_32 = arith.constant 0 : index
    %c0_33 = arith.constant 0 : index
    %26 = vector.load %arg5[%c0_30, %c0_31, %c0_32, %c0_33] : memref<1x8x8x8xf32, #tpu.memory_space<vmem>>, vector<1x1x8x8xf32>
    %27 = vector.shape_cast %26 : vector<1x1x8x8xf32> to vector<8x8xf32>
    %28 = vector.shape_cast %25 : vector<8x8xf32> to vector<1x1x8x8xf32>
    tpu.vector_store %arg5[%c0_30, %c0_31, %c0_32, %c0_33], %28 {strides = array<i32>} : memref<1x8x8x8xf32, #tpu.memory_space<vmem>>, vector<1x1x8x8xf32>,
    %29 = vector.extract_strided_slice %24 {offsets = [8, 0], sizes = [8, 8], strides = [1, 1]} : vector<64x8xf32> to vector<8x8xf32>
    %c0_34 = arith.constant 0 : index
    %c1_35 = arith.constant 1 : index
    %c0_36 = arith.constant 0 : index
    %c0_37 = arith.constant 0 : index
    %30 = vector.load %arg5[%c0_34, %c1_35, %c0_36, %c0_37] : memref<1x8x8x8xf32, #tpu.memory_space<vmem>>, vector<1x1x8x8xf32>
    %31 = vector.shape_cast %30 : vector<1x1x8x8xf32> to vector<8x8xf32>
    %32 = vector.shape_cast %29 : vector<8x8xf32> to vector<1x1x8x8xf32>
    tpu.vector_store %arg5[%c0_34, %c1_35, %c0_36, %c0_37], %32 {strides = array<i32>} : memref<1x8x8x8xf32, #tpu.memory_space<vmem>>, vector<1x1x8x8xf32>,
    %33 = vector.extract_strided_slice %24 {offsets = [16, 0], sizes = [8, 8], strides = [1, 1]} : vector<64x8xf32> to vector<8x8xf32>
    %c0_38 = arith.constant 0 : index
    %c2_39 = arith.constant 2 : index
    %c0_40 = arith.constant 0 : index
    %c0_41 = arith.constant 0 : index
    %34 = vector.load %arg5[%c0_38, %c2_39, %c0_40, %c0_41] : memref<1x8x8x8xf32, #tpu.memory_space<vmem>>, vector<1x1x8x8xf32>
    %35 = vector.shape_cast %34 : vector<1x1x8x8xf32> to vector<8x8xf32>
    %36 = vector.shape_cast %33 : vector<8x8xf32> to vector<1x1x8x8xf32>
    tpu.vector_store %arg5[%c0_38, %c2_39, %c0_40, %c0_41], %36 {strides = array<i32>} : memref<1x8x8x8xf32, #tpu.memory_space<vmem>>, vector<1x1x8x8xf32>,
    %37 = vector.extract_strided_slice %24 {offsets = [24, 0], sizes = [8, 8], strides = [1, 1]} : vector<64x8xf32> to vector<8x8xf32>
    %c0_42 = arith.constant 0 : index
    %c3_43 = arith.constant 3 : index
    %c0_44 = arith.constant 0 : index
    %c0_45 = arith.constant 0 : index
    %38 = vector.load %arg5[%c0_42, %c3_43, %c0_44, %c0_45] : memref<1x8x8x8xf32, #tpu.memory_space<vmem>>, vector<1x1x8x8xf32>
    %39 = vector.shape_cast %38 : vector<1x1x8x8xf32> to vector<8x8xf32>
    %40 = vector.shape_cast %37 : vector<8x8xf32> to vector<1x1x8x8xf32>
    tpu.vector_store %arg5[%c0_42, %c3_43, %c0_44, %c0_45], %40 {strides = array<i32>} : memref<1x8x8x8xf32, #tpu.memory_space<vmem>>, vector<1x1x8x8xf32>,
    %41 = vector.extract_strided_slice %24 {offsets = [32, 0], sizes = [8, 8], strides = [1, 1]} : vector<64x8xf32> to vector<8x8xf32>
    %c0_46 = arith.constant 0 : index
    %c4 = arith.constant 4 : index
    %c0_47 = arith.constant 0 : index
    %c0_48 = arith.constant 0 : index
    %42 = vector.load %arg5[%c0_46, %c4, %c0_47, %c0_48] : memref<1x8x8x8xf32, #tpu.memory_space<vmem>>, vector<1x1x8x8xf32>
    %43 = vector.shape_cast %42 : vector<1x1x8x8xf32> to vector<8x8xf32>
    %44 = vector.shape_cast %41 : vector<8x8xf32> to vector<1x1x8x8xf32>
    tpu.vector_store %arg5[%c0_46, %c4, %c0_47, %c0_48], %44 {strides = array<i32>} : memref<1x8x8x8xf32, #tpu.memory_space<vmem>>, vector<1x1x8x8xf32>,
    %45 = vector.extract_strided_slice %24 {offsets = [40, 0], sizes = [8, 8], strides = [1, 1]} : vector<64x8xf32> to vector<8x8xf32>
    %c0_49 = arith.constant 0 : index
    %c5 = arith.constant 5 : index
    %c0_50 = arith.constant 0 : index
    %c0_51 = arith.constant 0 : index
    %46 = vector.load %arg5[%c0_49, %c5, %c0_50, %c0_51] : memref<1x8x8x8xf32, #tpu.memory_space<vmem>>, vector<1x1x8x8xf32>
    %47 = vector.shape_cast %46 : vector<1x1x8x8xf32> to vector<8x8xf32>
    %48 = vector.shape_cast %45 : vector<8x8xf32> to vector<1x1x8x8xf32>
    tpu.vector_store %arg5[%c0_49, %c5, %c0_50, %c0_51], %48 {strides = array<i32>} : memref<1x8x8x8xf32, #tpu.memory_space<vmem>>, vector<1x1x8x8xf32>,
    %49 = vector.extract_strided_slice %24 {offsets = [48, 0], sizes = [8, 8], strides = [1, 1]} : vector<64x8xf32> to vector<8x8xf32>
    %c0_52 = arith.constant 0 : index
    %c6 = arith.constant 6 : index
    %c0_53 = arith.constant 0 : index
    %c0_54 = arith.constant 0 : index
    %50 = vector.load %arg5[%c0_52, %c6, %c0_53, %c0_54] : memref<1x8x8x8xf32, #tpu.memory_space<vmem>>, vector<1x1x8x8xf32>
    %51 = vector.shape_cast %50 : vector<1x1x8x8xf32> to vector<8x8xf32>
    %52 = vector.shape_cast %49 : vector<8x8xf32> to vector<1x1x8x8xf32>
    tpu.vector_store %arg5[%c0_52, %c6, %c0_53, %c0_54], %52 {strides = array<i32>} : memref<1x8x8x8xf32, #tpu.memory_space<vmem>>, vector<1x1x8x8xf32>,
    %53 = vector.extract_strided_slice %24 {offsets = [56, 0], sizes = [8, 8], strides = [1, 1]} : vector<64x8xf32> to vector<8x8xf32>
    %c0_55 = arith.constant 0 : index
    %c7 = arith.constant 7 : index
    %c0_56 = arith.constant 0 : index
    %c0_57 = arith.constant 0 : index
    %54 = vector.load %arg5[%c0_55, %c7, %c0_56, %c0_57] : memref<1x8x8x8xf32, #tpu.memory_space<vmem>>, vector<1x1x8x8xf32>
    %55 = vector.shape_cast %54 : vector<1x1x8x8xf32> to vector<8x8xf32>
    %56 = vector.shape_cast %53 : vector<8x8xf32> to vector<1x1x8x8xf32>
    tpu.vector_store %arg5[%c0_55, %c7, %c0_56, %c0_57], %56 {strides = array<i32>} : memref<1x8x8x8xf32, #tpu.memory_space<vmem>>, vector<1x1x8x8xf32>,
    return
  }
  func.func @transform_0(%arg0: i32, %arg1: i32) -> (i32, i32, i32, i32) {
    %c0_i32 = arith.constant 0 : i32
    %c0_i32_0 = arith.constant 0 : i32
    %c0_i32_1 = arith.constant 0 : i32
    return %arg0, %c0_i32, %arg1, %c0_i32_0 : i32, i32, i32, i32
  }
  func.func @transform_1(%arg0: i32, %arg1: i32) -> (i32, i32, i32) {
    %c0_i32 = arith.constant 0 : i32
    %c0_i32_0 = arith.constant 0 : i32
    %c0_i32_1 = arith.constant 0 : i32
    %c0_i32_2 = arith.constant 0 : i32
    return %c0_i32, %c0_i32_0, %c0_i32_1 : i32, i32, i32
  }
  func.func @transform_2(%arg0: i32, %arg1: i32) -> (i32, i32) {
    %c0_i32 = arith.constant 0 : i32
    %c0_i32_0 = arith.constant 0 : i32
    %c0_i32_1 = arith.constant 0 : i32
    return %c0_i32, %c0_i32_0 : i32, i32
  }
  func.func @transform_3(%arg0: i32, %arg1: i32) -> (i32, i32, i32, i32) {
    %c0_i32 = arith.constant 0 : i32
    %c0_i32_0 = arith.constant 0 : i32
    %c0_i32_1 = arith.constant 0 : i32
    return %arg0, %c0_i32, %arg1, %c0_i32_0 : i32, i32, i32, i32
  }
}

</mosaic_0001>

<bundles_post_ra>
// kernel: tpu_custom_call.1
= control target key start
LH: loop header
LB: loop body
LE: loop exit
PB: predicated region body
PF: predicated region fallthrough
CT: control target
= control target key end

     0   :  { %8 = vsyncpa [#allocation3], 0  ;;  %s1711_s0 = inlined_call_operand.vmem [shape: f32[2,4,16,16], index: 0, kind: input, shape index: {}]   ;;  %s1712_s1 = inlined_call_operand.vmem [shape: f32[4,64,16], index: 1, kind: input, shape index: {}]   ;;  %s1713_s2 = inlined_call_operand.vmem [shape: f32[16,8], index: 2, kind: input, shape index: {}]   ;;  %s1714_s3 = inlined_call_operand.hbm [shape: f32[2,8,8,8], index: 3, kind: output, shape index: {}]  }
   0x1   :  { %10 = vsyncpa [#allocation3 + $0x1], 0  ;;  %s1446_s12 = smov 0   ;;  %s1448_s13 = smov 0  }
   0x2   :  { %s1450_s14 = smov 0   ;;  %s1452_s15 = smov 0  }
   0x3   :  { %s1454_s16 = smov 0   ;;  %s1456_s17 = smov 0  }
   0x4 LB: > { %s1018_s18 = sadd.s32 4294967295, %s1421_s17   ;;  %s1019_s19 = sadd.s32 4294967294, %s1421_s17   ;;  %s1421_s17 = sphi %s1456_s17, %s16_s17   ;;  %s1417_s16 = sphi %s1454_s16, %s1721_s16   ;;  %s1413_s15 = sphi %s1452_s15, %s1720_s15   ;;  %s1409_s14 = sphi %s1450_s14, %s1719_s14   ;;  %s1405_s13 = sphi %s1448_s13, %s1718_s13   ;;  %s1401_s12 = sphi %s1446_s12, %s1717_s12  }
   0x5   : > { %s28_s20 = sadd.s32 1, %s1417_s16  ;;  %s107_s21 = sadd.s32 1, %s1409_s14 }
   0x6   : > { %p30_p0 = scmp.ge.s32.totalorder %s28_s20, 2  ;;  %p117_p1 = scmp.ne.s32.totalorder %s1409_s14, %s1405_s13 }
   0x7   : > { %p118_p2 = scmp.eq.s32.totalorder %s1018_s18, 1  ;;  %p123_p3 = scmp.ne.s32.totalorder %s1405_s13, %s1401_s12 }
   0x8   : > { %s1723_s20 = smov (%p30_p0, %s28_s20), 0  ;;  %p124_p5 = scmp.eq.s32.totalorder %s1019_s19, 1 }
   0x9   : > { %p1486_p4 = por %p118_p2, %p117_p1  ;;  %s102_s23 = ssub.s32 %s1417_s16, %s1723_s20 }
   0xa   : > { %p1022_p6 = scmp.ge.s32.totalorder %s1421_s17, 1  ;;  %p105_p7 = scmp.eq.s32.totalorder %s102_s23, 0 }
   0xb   : > { %p1493_p8 = por %p124_p5, %p123_p3  ;;  %p161_p9 = scmp.lt.s32.totalorder %s1421_s17, 3 }
   0xc   : > { %s1499_s25 = scalar_select %p105_p7, %s1409_s14, %s107_s21  }
   0xd   : > { %p162_p10 = pnand %p1022_p6, %p161_p9 }
   0xe   : > { %p190_p11 = scmp.lt.s32.totalorder (!%p162_p10), %s1413_s15, 1  ;;  %v199_v0 = vld [vmem:[%s1712_s1] sm:$0xff] (!%p162_p10)  ;;  %vm221_vm0 = vcmask (!%p162_p10), 130048   ;;  %v200_v13 = vld [vmem:[%s1712_s1 + $0x8] sm:$0xff] (!%p162_p10)  ;;  %v201_v14 = vld [vmem:[%s1712_s1 + $0x10] sm:$0xff] (!%p162_p10)  ;;  %vm909_vm1 = vcmask (!%p162_p10), 64512  }
   0xf   : > { %165 = sbr.rel (%p162_p10) target bundleno = 513 (0x201), region = 32  ;;  %1180 = vmatprep.mubr.msk.f32.mxu0 (!%p162_p10), %vm221_vm0, %v199_v0  ;;  %v1026_v1 = vld [vmem:[%s1712_s1 + $0x40] sm:$0xff] (!%p162_p10)  ;;  %v1027_v16 = vld [vmem:[%s1712_s1 + $0x48] sm:$0xff] (!%p162_p10)  ;;  %v1028_v17 = vld [vmem:[%s1712_s1 + $0x50] sm:$0xff] (!%p162_p10)  ;;  %s1423_s19 = smov (!%p162_p10), [#allocation2]  }
  0x10   : > { %1164 = vmatprep.mubr.msk.f32.mxu1 (!%p162_p10), %vm221_vm0, %v1026_v1  ;;  %v202_v18 = vld [vmem:[%s1712_s1 + $0x18] sm:$0xff] (!%p162_p10)  ;;  %v1052_v19 = vld [vmem:[%s1712_s1 + $0x80] sm:$0xff] (!%p162_p10)  ;;  %v1053_v22 = vld [vmem:[%s1712_s1 + $0x88] sm:$0xff] (!%p162_p10)  ;;  %s1347_s21 = sshll.u32 (!%p162_p10), %s1423_s19, 4  ;;  %s1348_s21 = int_to_ptr.vmem [resolvable:$false] %s1347_s21 }
  0x11   : > { %v1029_v20 = vld [vmem:[%s1712_s1 + $0x58] sm:$0xff] (!%p162_p10)  ;;  %v1030_v21 = vld [vmem:[%s1712_s1 + $0x60] sm:$0xff] (!%p162_p10)  ;;  %v1054_v23 = vld [vmem:[%s1712_s1 + $0x90] sm:$0xff] (!%p162_p10)  ;;  %s1349_s23 = scalar_lea.vmem (!%p162_p10), %s1348_s21, 2048 }
  0x12   : > { %v1031_v24 = vld [vmem:[%s1712_s1 + $0x68] sm:$0xff] (!%p162_p10)  ;;  %v1032_v25 = vld [vmem:[%s1712_s1 + $0x70] sm:$0xff] (!%p162_p10)  ;;  %v1055_v26 = vld [vmem:[%s1712_s1 + $0x98] sm:$0xff] (!%p162_p10) }
  0x13   : > { %v1056_v27 = vld [vmem:[%s1712_s1 + $0xa0] sm:$0xff] (!%p162_p10)  ;;  %v1033_v28 = vld [vmem:[%s1712_s1 + $0x78] sm:$0xff] (!%p162_p10)  ;;  %v1057_v30 = vld [vmem:[%s1712_s1 + $0xa8] sm:$0xff] (!%p162_p10) }
  0x14   : > { %v203_v29 = vld [vmem:[%s1712_s1 + $0x20] sm:$0xff] (!%p162_p10)  ;;  %v1058_v31 = vld [vmem:[%s1712_s1 + $0xb0] sm:$0xff] (!%p162_p10)  ;;  %v204_v32 = vld [vmem:[%s1712_s1 + $0x28] sm:$0xff] (!%p162_p10) }
  0x15   : > { %v205_v33 = vld [vmem:[%s1712_s1 + $0x30] sm:$0xff] (!%p162_p10)  ;;  %v1059_v34 = vld [vmem:[%s1712_s1 + $0xb8] sm:$0xff] (!%p162_p10)  ;;  %v1070_v35 = vld [vmem:[%s1712_s1 + $0xc0] sm:$0xff] (!%p162_p10) }
  0x16   : > { %s191_s30 = scalar_select %p190_p11, %s1413_s15, 1  ;;  %v206_v36 = vld [vmem:[%s1712_s1 + $0x38] sm:$0xff]  ;;  %v1071_v37 = vld [vmem:[%s1712_s1 + $0xc8] sm:$0xff]  ;;  %v1072_v38 = vld [vmem:[%s1712_s1 + $0xd0] sm:$0xff] }
  0x17   : > { %v1073_v39 = vld [vmem:[%s1712_s1 + $0xd8] sm:$0xff]  ;;  %v1074_v40 = vld [vmem:[%s1712_s1 + $0xe0] sm:$0xff]  ;;  %v1075_v41 = vld [vmem:[%s1712_s1 + $0xe8] sm:$0xff] }
  0x18   : > { %s1108_s4 = sshll.u32 %s191_s30, 6  ;;  %v1076_v42 = vld [vmem:[%s1712_s1 + $0xf0] sm:$0xff]  ;;  %v1077_v43 = vld [vmem:[%s1712_s1 + $0xf8] sm:$0xff]  ;;  %v778_v44 = vld [vmem:[%s1713_s2] sm:$0xff] }
  0x19   : > { %s197_s7 = scalar_lea.vmem %s1711_s0, %s1108_s4  ;;  %v779_v45 = vld [vmem:[%s1713_s2 + $0x8] sm:$0xff]  ;;  %s186_s4 = sand.u32 1, %s1405_s13  }
  0x1a   : > { %v207_v2 = vld [vmem:[%s197_s7] sm:$0xff]  ;;  %v208_v3 = vld [vmem:[%s197_s7 + $0x8] sm:$0xff]  ;;  %v1034_v7 = vld [vmem:[%s197_s7 + $0x10] sm:$0xff]  ;;  %v1256_v46 = vpack.c.bf16 %v779_v45, %v778_v44  ;;  %s1023_s5 = sshll.u32 %s186_s4, 6 }
  0x1b   : > { %v1060_v4 = vld [vmem:[%s197_s7 + $0x20] sm:$0xff]  ;;  %v1244_v5 = vpack.c.bf16 %v208_v3, %v207_v2  ;;  %v1061_v6 = vld [vmem:[%s197_s7 + $0x28] sm:$0xff]  ;;  %v1035_v8 = vld [vmem:[%s197_s7 + $0x18] sm:$0xff]  ;;  %s188_s6 = scalar_lea.vmem [#allocation2], %s1023_s5 }
  0x1c   : > { %v1248_v9 = vpack.c.bf16 %v1061_v6, %v1060_v4  ;;  %v1240_v10 = vpack.c.bf16 %v1035_v8, %v1034_v7  ;;  %v1078_v11 = vld [vmem:[%s197_s7 + $0x30] sm:$0xff]  ;;  %v1079_v12 = vld [vmem:[%s197_s7 + $0x38] sm:$0xff]  ;;  %s1109_s7 = sshll.u32 %s1413_s15, 10  ;;  %s940_s8 = sshll.u32 %s188_s6, 4  ;;  %s1661_s8 = int_to_ptr.vmem [resolvable:$true] %s940_s8 }
  0x1d   : > { %1245 = vmatprep.subr.bf16.mxu0 %v1244_v5  ;;  %v1252_v15 = vpack.c.bf16 %v1079_v12, %v1078_v11  ;;  %s1659_s11 = scalar_lea.hbm %s1714_s3, %s1109_s7  ;;  %s1665_s15 = scalar_lea.sflag [#allocation3], %s186_s4 }
  0x1e   : > { %1247 = vmatpush3.bf16.msra.mxu0 %v1244_v5  ;;  %1241 = vmatprep.subr.bf16.mxu1 %v1240_v10  ;;  %s1343_s18 = scalar_lea.vmem %s1661_s8, 1024  ;;  %p1350_p1 = scmp.lt.s32.totalorder %s1661_s8, %s1348_s21 }
  0x1f   : > { %1249 = vmatprep.subr.bf16.mxu0 %v1248_v9  ;;  %1243 = vmatpush3.bf16.msra.mxu1 %v1240_v10  ;;  %p1344_p12 = scmp.ne.s32.totalorder %s1661_s8, %s1343_s18  ;;  %p1351_p2 = scmp.lt.s32.totalorder %s1349_s23, %s1343_s18 }
  0x20   : > { %1260 = vmatprep.subr.bf16.mxu1 %v1244_v5 }
  0x21   : > { %1181 = vmatmul.mubr.msk.f32.vlgmr.msra.gmra.mrb[0].mxu0 %vm221_vm0, %v200_v13  ;;  %p1345_p13 = pnand %p1344_p12, %p1486_p4  ;;  %p1352_p3 = por %p1351_p2, %p1350_p1 }
  0x22   : > { %1251 = vmatpush3.bf16.msra.mxu0 %v1248_v9  ;;  %1183 = vmatprep.mubr.msk.f32.mxu0 %vm221_vm0, %v201_v14 }
  0x23   : > { %1165 = vmatmul.mubr.msk.f32.vlgmr.msra.gmra.mrb[0].mxu1 %vm221_vm0, %v1027_v16  ;;  %1253 = vmatprep.subr.bf16.mxu0 %v1252_v15  ;;  %p1346_p0 = pneg %p1345_p13 }
  0x24   : > { %1167 = vmatprep.mubr.msk.f32.mxu1 %vm221_vm0, %v1028_v17  ;;  %1261 = vmatpush3.bf16.msra.mxu1 %v1244_v5 }
  0x25   : > { %1184 = vmatmul.mubr.msk.f32.gmra.mrb[2].mxu0 %vm221_vm0, %v202_v18  ;;  %1257 = vmatprep.subr.bf16.mxu1 %v1256_v46  ;;  %p1353_p5 = pnand %p1352_p3, %p1346_p0 }
  0x26   : > { %1196 = vmatprep.mubr.msk.f32.mxu0 %vm221_vm0, %v1052_v19 }
  0x27   : > { %1168 = vmatmul.mubr.msk.f32.gmra.mrb[2].mxu1 %vm221_vm0, %v1029_v20 }
  0x28   : > { %1170 = vmatprep.mubr.msk.f32.mxu1 %vm221_vm0, %v1030_v21 }
  0x29   : > { %1197 = vmatmul.mubr.msk.f32.vlgmr.msra.gmra.mrb[0].mxu0 %vm221_vm0, %v1053_v22 }
  0x2a   : > { %1255 = vmatpush3.bf16.msra.mxu0 %v1252_v15  ;;  %1199 = vmatprep.mubr.msk.f32.mxu0 %vm221_vm0, %v1054_v23 }
  0x2b   : > { %1171 = vmatmul.mubr.msk.f32.gmra.mrb[4].mxu1 %vm221_vm0, %v1031_v24 }
  0x2c   : > { %1173 = vmatprep.mubr.msk.f32.mxu1 %vm221_vm0, %v1032_v25 }
  0x2d   : > { %1200 = vmatmul.mubr.msk.f32.gmra.mrb[2].mxu0 %vm221_vm0, %v1055_v26 }
  0x2e   : > { %1202 = vmatprep.mubr.msk.f32.mxu0 %vm221_vm0, %v1056_v27 }
  0x2f   : > { %1174 = vmatmul.mubr.msk.f32.gmra.mrb[6].mxu1 %vm221_vm0, %v1033_v28 }
  0x30   : > { %1186 = vmatprep.mubr.msk.f32.mxu1 %vm221_vm0, %v203_v29 }
  0x31   : > { %1203 = vmatmul.mubr.msk.f32.gmra.mrb[4].mxu0 %vm221_vm0, %v1057_v30 }
  0x32   : > { %1205 = vmatprep.mubr.msk.f32.mxu0 %vm221_vm0, %v1058_v31 }
  0x33   : > { %1187 = vmatmul.mubr.msk.f32.vlgmr.msra.gmra.mrb[4].mxu1 %vm221_vm0, %v204_v32 }
  0x34   : > { %1189 = vmatprep.mubr.msk.f32.mxu1 %vm221_vm0, %v205_v33  ;;  %1259 = vmatpush3.bf16.msra.mxu1 %v1256_v46 }
  0x35   : > { %1206 = vmatmul.mubr.msk.f32.gmra.mrb[6].mxu0 %vm221_vm0, %v1059_v34 }
  0x36   : > { %1212 = vmatprep.mubr.msk.f32.mxu0 %vm221_vm0, %v1070_v35 }
  0x37   : > { %1190 = vmatmul.mubr.msk.f32.gmra.mrb[6].mxu1 %vm221_vm0, %v206_v36 }
  0x39   : > { %1213 = vmatmul.mubr.msk.f32.vlgmr.msra.gmra.mrb[0].mxu0 %vm221_vm0, %v1071_v37 }
  0x3a   : > { %1215 = vmatprep.mubr.msk.f32.mxu0 %vm221_vm0, %v1072_v38 }
  0x3d   : > { %1216 = vmatmul.mubr.msk.f32.gmra.mrb[2].mxu0 %vm221_vm0, %v1073_v39 }
  0x3e   : > { %1218 = vmatprep.mubr.msk.f32.mxu0 %vm221_vm0, %v1074_v40 }
  0x41   : > { %1219 = vmatmul.mubr.msk.f32.gmra.mrb[4].mxu0 %vm221_vm0, %v1075_v41 }
  0x42   : > { %1221 = vmatprep.mubr.msk.f32.mxu0 %vm221_vm0, %v1076_v42 }
  0x45   : > { %1222 = vmatmul.mubr.msk.f32.gmra.mrb[6].mxu0 %vm221_vm0, %v1077_v43 }
  0xf6   : > { %v1166_v47 = vpop.f32.mrb[0].mxu1 }
  0xf7   : > { %v312_v48 = vpop.f32.mrb[1].mxu1 }
  0xfa   : > { %v1169_v49 = vpop.f32.mrb[2].mxu1 }
  0xfb   : > { %v322_v50 = vpop.f32.mrb[3].mxu1 }
 0x106   : > { %v1188_v51 = vpop.f32.mrb[4].mxu1 }
 0x107   : > { %v461_v52 = vpop.f32.mrb[5].mxu1 }
 0x10a   : > { %v1191_v53 = vpop.f32.mrb[6].mxu1 }
 0x10b   : > { %v471_v54 = vpop.f32.mrb[7].mxu1 }
 0x10c   : > { %v1214_v55 = vpop.f32.mrb[0].mxu0 }
 0x10d   : > { %v1262_v56 = vadd.f32 %v1214_v55, %v1166_v47  ;;  %v731_v57 = vpop.f32.mrb[1].mxu0 }
 0x10e   : > { %v1263_v58 = vadd.f32 %v731_v57, %v312_v48 }
 0x110   : > { %v1217_v59 = vpop.f32.mrb[2].mxu0  ;;  %1228 = vmatprep.mubr.msk.f32.mxu1 %vm221_vm0, %v1263_v58 }
 0x111   : > { %v1264_v60 = vadd.f32 %v1217_v59, %v1169_v49  ;;  %v741_v61 = vpop.f32.mrb[3].mxu0  ;;  %1229 = vmatmul.mubr.msk.f32.vlgmr.msra.gmra.mrb[8].mxu1 %vm221_vm0, %v1262_v56 }
 0x112   : > { %v1265_v62 = vadd.f32 %v741_v61, %v322_v50 }
 0x114   : > { %v1220_v63 = vpop.f32.mrb[4].mxu0  ;;  %1231 = vmatprep.mubr.msk.f32.mxu1 %vm221_vm0, %v1265_v62 }
 0x115   : > { %v1266_v0 = vadd.f32 %v1220_v63, %v1188_v51  ;;  %v751_v1 = vpop.f32.mrb[5].mxu0  ;;  %1232 = vmatmul.mubr.msk.f32.gmra.mrb[10].mxu1 %vm221_vm0, %v1264_v60 }
 0x116   : > { %v1267_v2 = vadd.f32 %v751_v1, %v461_v52 }
 0x118   : > { %v1223_v3 = vpop.f32.mrb[6].mxu0  ;;  %1234 = vmatprep.mubr.msk.f32.mxu1 %vm221_vm0, %v1267_v2 }
 0x119   : > { %v1268_v4 = vadd.f32 %v1223_v3, %v1191_v53  ;;  %v761_v5 = vpop.f32.mrb[7].mxu0  ;;  %1235 = vmatmul.mubr.msk.f32.gmra.mrb[12].mxu1 %vm221_vm0, %v1266_v0 }
 0x11a   : > { %v1269_v6 = vadd.f32 %v761_v5, %v471_v54 }
 0x11c   : > { %1237 = vmatprep.mubr.msk.f32.mxu1 %vm221_vm0, %v1269_v6 }
 0x11d   : > { %1238 = vmatmul.mubr.msk.f32.gmra.mrb[14].mxu1 %vm221_vm0, %v1268_v4 }
 0x1e4   : > { %v1230_v7 = vpop.f32.mrb[8].mxu1 }
 0x1e5   : > { %1096 = vst.msk [vmem:[%s188_s6 + $0x8] sm:$0xff] %vm909_vm1, %v1230_v7  ;;  %v870_v8 = vpop.f32.mrb[9].mxu1 }
 0x1e6   : > { %910 = vst.msk [vmem:[%s188_s6] sm:$0xff] %vm909_vm1, %v870_v8 }
 0x1e8   : > { %v1233_v9 = vpop.f32.mrb[10].mxu1 }
 0x1e9   : > { %1098 = vst.msk [vmem:[%s188_s6 + $0x18] sm:$0xff] %vm909_vm1, %v1233_v9  ;;  %v880_v10 = vpop.f32.mrb[11].mxu1 }
 0x1ea   : > { %1097 = vst.msk [vmem:[%s188_s6 + $0x10] sm:$0xff] %vm909_vm1, %v880_v10 }
 0x1ec   : > { %v1236_v11 = vpop.f32.mrb[12].mxu1 }
 0x1ed   : > { %1100 = vst.msk [vmem:[%s188_s6 + $0x28] sm:$0xff] %vm909_vm1, %v1236_v11  ;;  %v890_v12 = vpop.f32.mrb[13].mxu1 }
 0x1ee   : > { %1099 = vst.msk [vmem:[%s188_s6 + $0x20] sm:$0xff] %vm909_vm1, %v890_v12 }
 0x1f0   : > { %v1239_v13 = vpop.f32.mrb[14].mxu1 }
 0x1f1   : > { %1102 = vst.msk [vmem:[%s188_s6 + $0x38] sm:$0xff] %vm909_vm1, %v1239_v13  ;;  %v900_v14 = vpop.f32.mrb[15].mxu1 }
 0x1f2   : > { %1101 = vst.msk [vmem:[%s188_s6 + $0x30] sm:$0xff] %vm909_vm1, %v900_v14 }
 0x1f3   : > { %1356 = shalt.err (!%p1353_p5)
}
 0x1f4   : > { %s1357_s26 = scalar_lea.hbm %s1659_s11, 1024  ;;  %s1361_s29 = scalar_lea.hbm %s1714_s3, 2048 }
 0x1f5   : > { %p1358_p6 = scmp.ne.s32.totalorder %s1659_s11, %s1357_s26  ;;  %p1362_p10 = scmp.lt.u32.totalorder %s1659_s11, %s1714_s3 }
 0x1f6   : > { %p1363_p11 = scmp.lt.u32.totalorder %s1361_s29, %s1357_s26  ;;  %p1365_p13 = scmp.lt.u32.totalorder %s1357_s26, %s1659_s11 }
 0x1f7   : > { %p1359_p7 = pnand %p1358_p6, %p1486_p4 }
 0x1f8   : > { %p1364_p12 = por %p1363_p11, %p1362_p10 }
 0x1f9   : > { %p1360_p9 = pneg %p1359_p7 }
 0x1fa   : > { %p1366_p0 = por %p1365_p13, %p1364_p12 }
 0x1fc   : > { %p1367_p1 = pnand %p1366_p0, %p1360_p9 }
 0x1fe   : > { %1370 = shalt.err (!%p1367_p1)
}
 0x1ff   : > { %s1424_s5 = smov 128   ;;  %s1425_s6 = smov 8  }
 0x200   : > { %1286 = dma.vmem_to_hbm [thread:$0]  (%p1486_p4), %s1661_s8, 1024, %s1659_s11, %s1665_s15, %s1424_s5, %s1424_s5, %s1425_s6  }
 0x201 PF: > { %p1292_p2 = scmp.ge.s32.totalorder %s1421_s17, 2  ;;  %s955_s7 = sand.u32 1, %s1401_s12  }
 0x202   : > { %s956_s9 = scalar_lea.sflag [#allocation3], %s955_s7 }
 0x203   : > { %p1289_p3 = pnand %p1292_p2, %p1493_p8 }
 0x205   : > { %1396 = dma.done.wait (!%p1289_p3), %s956_s9, 1024  }
 0x206   : > { %1398 = vsyncadd (!%p1289_p3), %s956_s9, 4294966272  ;;  %s16_s17 = sadd.s32 1, %s1421_s17   ;;  %s1717_s12 = smov %s1405_s13 }
 0x207   : > { %p13_p5 = scmp.ge.s32.totalorder %s16_s17, 4   ;;  %s1718_s13 = smov %s1409_s14 }
 0x208   : > { %s1719_s14 = smov %s1499_s25  ;;  %s1720_s15 = smov %s1417_s16 }
 0x209   : > { %s1721_s16 = smov %s1723_s20  ;;  %15 = sbr.rel (!%p13_p5) target bundleno = 4 (0x4), region = 80 }
 0x210   :  { %961 = vsyncpa [#allocation3], 1 }
 0x211   :  { %963 = vsyncpa [#allocation3 + $0x1], 1 }

</bundles_post_ra>
